<compile_context>
chip_gen: v7x
topology: tpu7x:2x2x1
jax: 0.10.0
libtpu: 0.0.40
codegen_flags: <defaults>
</compile_context>

<pallas_src>
import math

import jax
import jax.numpy as jnp
from jax.experimental import pallas as pl
from jax.experimental.pallas import tpu as pltpu


def _round_up(x, m):
    return ((x + m - 1) // m) * m


# ---------------------------------------------------------------------------
# Pallas kernel: split first matmul (state/action halves of W1) + bias,
# ReLU, second matmul + bias.  Everything accumulates in f32 on the MXU.
# ---------------------------------------------------------------------------
def critic_drr_kernel(s_ref, a_ref, w1s_ref, w1a_ref, b1_ref, w2_ref, b2_ref,
                      o_ref):
    # [state action] @ W1 == state @ W1[:S] + action @ W1[S:]  (no lane concat)
    h = jnp.dot(s_ref[...], w1s_ref[...], preferred_element_type=jnp.float32)
    h = h + jnp.dot(a_ref[...], w1a_ref[...],
                    preferred_element_type=jnp.float32)
    h = h + b1_ref[...].astype(jnp.float32)
    h = jnp.maximum(h, 0.0)                                   # ReLU (VPU)
    o = jnp.dot(h.astype(w2_ref.dtype), w2_ref[...],
                preferred_element_type=jnp.float32)
    o = o + b2_ref[...].astype(jnp.float32)
    o_ref[...] = o.astype(o_ref.dtype)


# ---------------------------------------------------------------------------
# One-time parameter preparation (hoisted out of the per-call path).
# ---------------------------------------------------------------------------
def prepare_critic_params(w1, b1, w2, b2, state_repr_dim, *,
                          out_width=128, dtype=jnp.float32):
    """Split W1 for the in-kernel concat, reshape biases, lane-pad W2/b2.

    out_width: width of the output slab the kernel writes.  128 -> unmasked
    lane-dense stores (best for small/medium B).  For very large production B
    pick 8 (or 1) to avoid writing 128x the needed output bytes.
    """
    S = state_repr_dim
    H = w1.shape[1]
    w1_s = w1[:S, :].astype(dtype)                       # (S, H)
    w1_a = w1[S:, :].astype(dtype)                       # (A, H)
    b1_r = b1.reshape(1, H).astype(dtype)                # (1, H)
    w2_p = jnp.zeros((H, out_width), dtype).at[:, :1].set(w2.astype(dtype))
    b2_p = jnp.zeros((1, out_width), dtype).at[:, :1].set(
        b2.reshape(1, 1).astype(dtype))
    return (w1_s, w1_a, b1_r, w2_p, b2_p)


# ---------------------------------------------------------------------------
# Forward wrapper: batch-tiled 1-D grid, weights VMEM-resident across steps.
# ---------------------------------------------------------------------------
def critic_drr_forward(state, action, params, *, tb=512):
    """state: (B, S), action: (B, A) -> (B, 1) Q-values."""
    w1_s, w1_a, b1_r, w2_p, b2_p = params
    B, S = state.shape
    A = action.shape[1]
    H = w1_s.shape[1]
    out_p = w2_p.shape[1]
    in_dtype = w1_s.dtype

    # bf16 packs 16 rows per sublane group -> batch tile multiple of 16.
    mult = 16 if in_dtype == jnp.bfloat16 else 8

    # Batch tiling: force tb to a multiple of `mult`; keep >= 2 grid steps
    # whenever the batch allows it so v7x's two TensorCores both get work
    # (the batch axis is marked "parallel"; harmless on v5e/v6e).
    tb = max(mult, (int(tb) // mult) * mult)
    b_ceil = _round_up(B, mult)
    if tb >= b_ceil:
        tb = max(mult, _round_up(pl.cdiv(b_ceil, 2), mult))
    b_p = _round_up(b_ceil, tb)

    state = state.astype(in_dtype)
    action = action.astype(in_dtype)
    if b_p != B:
        state = jnp.pad(state, ((0, b_p - B), (0, 0)))
        action = jnp.pad(action, ((0, b_p - B), (0, 0)))

    itm = jnp.dtype(in_dtype).itemsize
    cost = pl.CostEstimate(
        flops=2 * b_p * H * (S + A + out_p),
        transcendentals=0,
        bytes_accessed=(b_p * (S + A) * itm                        # inputs
                        + ((S + A) * H + H + H * out_p + out_p) * itm  # weights
                        + b_p * out_p * 4))                        # output

    grid = (b_p // tb,)
    out = pl.pallas_call(
        critic_drr_kernel,
        out_shape=jax.ShapeDtypeStruct((b_p, out_p), jnp.float32),
        grid=grid,
        in_specs=[
            pl.BlockSpec((tb, S), lambda i: (i, 0)),      # state (true width)
            pl.BlockSpec((tb, A), lambda i: (i, 0)),      # action (true width)
            pl.BlockSpec((S, H), lambda i: (0, 0)),       # W1[:S]  VMEM-resident
            pl.BlockSpec((A, H), lambda i: (0, 0)),       # W1[S:]  VMEM-resident
            pl.BlockSpec((1, H), lambda i: (0, 0)),       # b1
            pl.BlockSpec((H, out_p), lambda i: (0, 0)),   # W2 (lane-padded)
            pl.BlockSpec((1, out_p), lambda i: (0, 0)),   # b2 (lane-padded)
        ],
        out_specs=pl.BlockSpec((tb, out_p), lambda i: (i, 0)),
        compiler_params=pltpu.CompilerParams(
            dimension_semantics=("parallel",)),
        cost_estimate=cost,
    )(state, action, w1_s, w1_a, b1_r, w2_p, b2_p)

    # Drop batch padding and the padded output lanes.
    return out[:B, :1]


# ---------------------------------------------------------------------------
# Deterministic parameter init (mirrors Critic_DRR.initialize + Linear defaults)
# ---------------------------------------------------------------------------
def init_critic_params(key, state_repr_dim, action_emb_dim, hidden_dim):
    in_dim = state_repr_dim + action_emb_dim
    k1, k2, k3, k4 = jax.random.split(key, 4)

    # nn.init.kaiming_uniform_ (a=0, fan_in): bound = sqrt(6 / fan_in)
    bound1 = math.sqrt(6.0 / in_dim)
    w1 = jax.random.uniform(k1, (in_dim, hidden_dim), jnp.float32,
                            -bound1, bound1)
    # nn.Linear default bias init: U(-1/sqrt(fan_in), 1/sqrt(fan_in))
    bb1 = 1.0 / math.sqrt(in_dim)
    b1 = jax.random.uniform(k2, (hidden_dim,), jnp.float32, -bb1, bb1)

    bound2 = math.sqrt(6.0 / hidden_dim)
    w2 = jax.random.uniform(k3, (hidden_dim, 1), jnp.float32, -bound2, bound2)
    bb2 = 1.0 / math.sqrt(hidden_dim)
    b2 = jax.random.uniform(k4, (1,), jnp.float32, -bb2, bb2)
    return w1, b1, w2, b2


# ---------------------------------------------------------------------------
# Main
# ---------------------------------------------------------------------------
if __name__ == "__main__":
    embedding_dim = 8
    state_repr_dim = embedding_dim * 3   # DRR state representation width
    action_emb_dim = embedding_dim
    hidden_dim = 16
    batch = 256                          # -> 2 parallel grid steps of 128 rows

    key = jax.random.PRNGKey(0)
    k_state, k_action, k_params = jax.random.split(key, 3)

    state = jax.random.normal(k_state, (batch, state_repr_dim),
                              jnp.float32) * 0.01
    action = jax.random.normal(k_action, (batch, action_emb_dim),
                               jnp.float32) * 0.01

    w1, b1, w2, b2 = init_critic_params(k_params, state_repr_dim,
                                        action_emb_dim, hidden_dim)

    # One-time prep (hoisted); f32 here for a tight reference check.
    # For production: dtype=jnp.bfloat16 halves HBM reads; out_width=8 for
    # very large batches to cut output store traffic.
    params = prepare_critic_params(w1, b1, w2, b2, state_repr_dim,
                                   out_width=128, dtype=jnp.float32)

    out = critic_drr_forward(state, action, params, tb=512)
    out = jax.block_until_ready(out)

    # Pure-JAX reference of Critic_DRR.forward.
    x_cat = jnp.concatenate([state, action], axis=1)
    ref = jnp.maximum(x_cat @ w1 + b1, 0.0) @ w2 + b2
    assert out.shape == (batch, 1)
    assert jnp.allclose(out, ref, atol=1e-5), "mismatch vs reference"

    print("KERNEL_OK")
</pallas_src>

<mosaic_0001>
module attributes {stable_mosaic.version = 11 : i64} {
  func.func @critic_drr_kernel(%arg0: i32, %arg1: memref<128x24xf32, #tpu.memory_space<vmem>>, %arg2: memref<128x8xf32, #tpu.memory_space<vmem>>, %arg3: memref<24x16xf32, #tpu.memory_space<vmem>>, %arg4: memref<8x16xf32, #tpu.memory_space<vmem>>, %arg5: memref<1x16xf32, #tpu.memory_space<vmem>>, %arg6: memref<16x128xf32, #tpu.memory_space<vmem>>, %arg7: memref<1x128xf32, #tpu.memory_space<vmem>>, %arg8: memref<128x128xf32, #tpu.memory_space<vmem>>) attributes {dimension_semantics = [#tpu.dimension_semantics<parallel>], iteration_bounds = array<i64: 2>, scalar_prefetch = 0 : i64, scratch_operands = 0 : i64, tpu.core_type = #tpu.core_type<tc>, window_params = [{transform_indices = @transform_0, window_bounds = array<i64: 128, 24>}, {transform_indices = @transform_1, window_bounds = array<i64: 128, 8>}, {pipeline_mode = #tpu.pipeline_mode<synchronous>, transform_indices = @transform_2, window_bounds = array<i64: 24, 16>}, {pipeline_mode = #tpu.pipeline_mode<synchronous>, transform_indices = @transform_3, window_bounds = array<i64: 8, 16>}, {pipeline_mode = #tpu.pipeline_mode<synchronous>, transform_indices = @transform_4, window_bounds = array<i64: 1, 16>}, {pipeline_mode = #tpu.pipeline_mode<synchronous>, transform_indices = @transform_5, window_bounds = array<i64: 16, 128>}, {pipeline_mode = #tpu.pipeline_mode<synchronous>, transform_indices = @transform_6, window_bounds = array<i64: 1, 128>}, {transform_indices = @transform_7, window_bounds = array<i64: 128, 128>}]} {
    %c0 = arith.constant 0 : index
    %c0_0 = arith.constant 0 : index
    %0 = vector.load %arg1[%c0, %c0_0] : memref<128x24xf32, #tpu.memory_space<vmem>>, vector<128x24xf32>
    %c0_1 = arith.constant 0 : index
    %c0_2 = arith.constant 0 : index
    %1 = vector.load %arg3[%c0_1, %c0_2] : memref<24x16xf32, #tpu.memory_space<vmem>>, vector<24x16xf32>
    %cst = arith.constant dense<0.000000e+00> : vector<128x16xf32>
    %2 = tpu.matmul %0, %1, %cst {dimension_numbers = #tpu.dot_dimension_numbers<[1], [0], [0], [1], [0, 0, 1, 1], [], []>} : vector<128x24xf32>, vector<24x16xf32>, vector<128x16xf32> -> vector<128x16xf32>
    %c0_3 = arith.constant 0 : index
    %c0_4 = arith.constant 0 : index
    %3 = vector.load %arg2[%c0_3, %c0_4] : memref<128x8xf32, #tpu.memory_space<vmem>>, vector<128x8xf32>
    %c0_5 = arith.constant 0 : index
    %c0_6 = arith.constant 0 : index
    %4 = vector.load %arg4[%c0_5, %c0_6] : memref<8x16xf32, #tpu.memory_space<vmem>>, vector<8x16xf32>
    %cst_7 = arith.constant dense<0.000000e+00> : vector<128x16xf32>
    %5 = tpu.matmul %3, %4, %cst_7 {dimension_numbers = #tpu.dot_dimension_numbers<[1], [0], [0], [1], [0, 0, 1, 1], [], []>} : vector<128x8xf32>, vector<8x16xf32>, vector<128x16xf32> -> vector<128x16xf32>
    %6 = arith.addf %2, %5 : vector<128x16xf32>
    %c0_8 = arith.constant 0 : index
    %c0_9 = arith.constant 0 : index
    %7 = vector.load %arg5[%c0_8, %c0_9] : memref<1x16xf32, #tpu.memory_space<vmem>>, vector<1x16xf32>
    %8 = vector.broadcast %7 : vector<1x16xf32> to vector<128x16xf32>
    %9 = arith.addf %6, %8 : vector<128x16xf32>
    %cst_10 = arith.constant 0.000000e+00 : f32
    %10 = vector.broadcast %cst_10 : f32 to vector<128x16xf32>
    %11 = arith.maximumf %9, %10 : vector<128x16xf32>
    %c0_11 = arith.constant 0 : index
    %c0_12 = arith.constant 0 : index
    %12 = vector.load %arg6[%c0_11, %c0_12] : memref<16x128xf32, #tpu.memory_space<vmem>>, vector<16x128xf32>
    %cst_13 = arith.constant dense<0.000000e+00> : vector<128x128xf32>
    %13 = tpu.matmul %11, %12, %cst_13 {dimension_numbers = #tpu.dot_dimension_numbers<[1], [0], [0], [1], [0, 0, 1, 1], [], []>} : vector<128x16xf32>, vector<16x128xf32>, vector<128x128xf32> -> vector<128x128xf32>
    %c0_14 = arith.constant 0 : index
    %c0_15 = arith.constant 0 : index
    %14 = vector.load %arg7[%c0_14, %c0_15] : memref<1x128xf32, #tpu.memory_space<vmem>>, vector<1x128xf32>
    %15 = vector.broadcast %14 : vector<1x128xf32> to vector<128x128xf32>
    %16 = arith.addf %13, %15 : vector<128x128xf32>
    %c0_16 = arith.constant 0 : index
    %c0_17 = arith.constant 0 : index
    %17 = vector.load %arg8[%c0_16, %c0_17] : memref<128x128xf32, #tpu.memory_space<vmem>>, vector<128x128xf32>
    tpu.vector_store %arg8[%c0_16, %c0_17], %16 {strides = array<i32>} : memref<128x128xf32, #tpu.memory_space<vmem>>, vector<128x128xf32>,
    return
  }
  func.func @transform_0(%arg0: i32) -> (i32, i32) {
    %c0_i32 = arith.constant 0 : i32
    %c0_i32_0 = arith.constant 0 : i32
    return %arg0, %c0_i32 : i32, i32
  }
  func.func @transform_1(%arg0: i32) -> (i32, i32) {
    %c0_i32 = arith.constant 0 : i32
    %c0_i32_0 = arith.constant 0 : i32
    return %arg0, %c0_i32 : i32, i32
  }
  func.func @transform_2(%arg0: i32) -> (i32, i32) {
    %c0_i32 = arith.constant 0 : i32
    %c0_i32_0 = arith.constant 0 : i32
    %c0_i32_1 = arith.constant 0 : i32
    return %c0_i32, %c0_i32_0 : i32, i32
  }
  func.func @transform_3(%arg0: i32) -> (i32, i32) {
    %c0_i32 = arith.constant 0 : i32
    %c0_i32_0 = arith.constant 0 : i32
    %c0_i32_1 = arith.constant 0 : i32
    return %c0_i32, %c0_i32_0 : i32, i32
  }
  func.func @transform_4(%arg0: i32) -> (i32, i32) {
    %c0_i32 = arith.constant 0 : i32
    %c0_i32_0 = arith.constant 0 : i32
    %c0_i32_1 = arith.constant 0 : i32
    return %c0_i32, %c0_i32_0 : i32, i32
  }
  func.func @transform_5(%arg0: i32) -> (i32, i32) {
    %c0_i32 = arith.constant 0 : i32
    %c0_i32_0 = arith.constant 0 : i32
    %c0_i32_1 = arith.constant 0 : i32
    return %c0_i32, %c0_i32_0 : i32, i32
  }
  func.func @transform_6(%arg0: i32) -> (i32, i32) {
    %c0_i32 = arith.constant 0 : i32
    %c0_i32_0 = arith.constant 0 : i32
    %c0_i32_1 = arith.constant 0 : i32
    return %c0_i32, %c0_i32_0 : i32, i32
  }
  func.func @transform_7(%arg0: i32) -> (i32, i32) {
    %c0_i32 = arith.constant 0 : i32
    %c0_i32_0 = arith.constant 0 : i32
    return %arg0, %c0_i32 : i32, i32
  }
}

</mosaic_0001>

<bundles_post_ra>
// kernel: tpu_custom_call.1
= control target key start
LH: loop header
LB: loop body
LE: loop exit
PB: predicated region body
PF: predicated region fallthrough
CT: control target
= control target key end

     0   :  { %12 = vsyncpa [#allocation3], 0  ;;  %s1703_s0 = inlined_call_operand.vmem [shape: f32[256,24], index: 0, kind: input, shape index: {}]   ;;  %s1704_s1 = inlined_call_operand.vmem [shape: f32[256,8], index: 1, kind: input, shape index: {}]   ;;  %s1705_s2 = inlined_call_operand.vmem [shape: f32[24,16], index: 2, kind: input, shape index: {}]   ;;  %s1706_s3 = inlined_call_operand.vmem [shape: f32[8,16], index: 3, kind: input, shape index: {}]   ;;  %s1707_s4 = inlined_call_operand.vmem [shape: f32[1,16], index: 4, kind: input, shape index: {}]   ;;  %s1708_s5 = inlined_call_operand.vmem [shape: f32[16,128], index: 5, kind: input, shape index: {}]   ;;  %s1709_s6 = inlined_call_operand.vmem [shape: f32[1,128], index: 6, kind: input, shape index: {}]   ;;  %s1710_s7 = inlined_call_operand.hbm [shape: f32[256,128], index: 7, kind: output, shape index: {}]  }
   0x1   :  { %14 = vsyncpa [#allocation3 + $0x1], 0  ;;  %s1449_s24 = smov 0   ;;  %s1451_s25 = smov 0  }
   0x2   :  { %s1453_s26 = smov 0   ;;  %s1455_s27 = smov 0  }
   0x3 LB: > { %s1470_s28 = sadd.s32 4294967295, %s1404_s27   ;;  %s1072_s29 = sadd.s32 4294967294, %s1404_s27   ;;  %s1404_s27 = sphi %s1455_s27, %s1716_s27   ;;  %s1400_s26 = sphi %s1453_s26, %s1715_s26   ;;  %s1396_s25 = sphi %s1451_s25, %s1714_s25   ;;  %s1392_s24 = sphi %s1449_s24, %s1713_s24  }
   0x4   : > { %s1474_s30 = sadd.s32 1, %s1404_s27   ;;  %s184_s8 = sadd.s32 1, %s1400_s26 }
   0x5   : > { %s181_s9 = ssub.s32 %s1404_s27, %s1474_s30  ;;  %p194_p0 = scmp.ne.s32.totalorder %s1400_s26, %s1396_s25 }
   0x6   : > { %p182_p1 = scmp.eq.s32.totalorder %s181_s9, 0  ;;  %p195_p2 = scmp.eq.s32.totalorder %s1470_s28, 1 }
   0x7   : > { %p200_p3 = scmp.ne.s32.totalorder %s1396_s25, %s1392_s24  ;;  %p201_p4 = scmp.eq.s32.totalorder %s1072_s29, 1 }
   0x8   : > { %s1485_s10 = scalar_select %p182_p1, %s1400_s26, %s184_s8  }
   0x9   : > { %p1487_p5 = por %p195_p2, %p194_p0  ;;  %p1491_p6 = por %p201_p4, %p200_p3 }
   0xa   : > { %p1075_p7 = scmp.ge.s32.totalorder %s1404_s27, 1  ;;  %p252_p8 = scmp.lt.s32.totalorder %s1404_s27, 3 }
   0xc   : > { %p253_p9 = pnand %p1075_p7, %p252_p8 }
   0xd   : > { %v337_v0 = vld [vmem:[%s1706_s3] sm:$0xff] (!%p253_p9)  ;;  %s1077_s15 = sshll.u32 (!%p253_p9), %s1470_s28, 4  ;;  %v319_v2 = vld [vmem:[%s1705_s2 + $0x8] sm:$0xff] (!%p253_p9)  ;;  %vm338_vm0 = vcmask (!%p253_p9), 64512   ;;  %v320_v10 = vld [vmem:[%s1705_s2 + $0x10] sm:$0xff] (!%p253_p9)  ;;  %vm532_vm1 = vcmask (!%p253_p9), 195584  }
   0xe   : > { %256 = sbr.rel (%p253_p9) target bundleno = 520 (0x208), region = 48  ;;  %v318_v1 = vld [vmem:[%s1705_s2] sm:$0xff] (!%p253_p9)  ;;  %1191 = vmatprep.subr.mxu0 (!%p253_p9), %v337_v0  ;;  %p290_p10 = scmp.lt.s32.totalorder (!%p253_p9), %s1077_s15, 31  ;;  %1283 = vmatprep.subr.mxu1 (!%p253_p9), %v337_v0  ;;  %v766_v5 = vld [vmem:[%s1708_s5 + $0x8] sm:$0xff] (!%p253_p9)  ;;  %vm774_vm2 = vcmask (!%p253_p9), 130048  }
   0xf   : > { %v1275_v3 = vpack.c.bf16 (!%p253_p9), %v319_v2, %v318_v1  ;;  %v765_v4 = vld [vmem:[%s1708_s5] sm:$0xff] (!%p253_p9)  ;;  %1192 = vmatpush3.msra.mxu0 (!%p253_p9), %v337_v0  ;;  %1284 = vmatpush3.msra.mxu1 (!%p253_p9), %v337_v0  ;;  %s286_s21 = sand.u32 (!%p253_p9), 1, %s1396_s25   ;;  %s1136_s9 = sshll.u32 (!%p253_p9), %s1470_s28, 11 }
  0x10   : > { %v1279_v6 = vpack.c.bf16 (!%p253_p9), %v766_v5, %v765_v4  ;;  %v1593_v44 = vld [vmem:[%s1707_s4] ss:$0 sm:$0xff] (!%p253_p9)  ;;  %s1076_s22 = sshll.u32 (!%p253_p9), %s286_s21, 7  ;;  %s1654_s16 = scalar_lea.hbm (!%p253_p9), %s1710_s7, %s1136_s9 }
  0x11   : > { %1276 = vmatprep.subr.bf16.mxu0 (!%p253_p9), %v1275_v3  ;;  %s1633_s8 = scalar_lea.vmem (!%p253_p9), [#allocation2], %s1076_s22  ;;  %s1662_s28 = scalar_lea.sflag (!%p253_p9), [#allocation3], %s286_s21 }
  0x12   : > { %1280 = vmatprep.subr.bf16.mxu1 (!%p253_p9), %v1279_v6 }
  0x15   : > { %s1718_s15 = smov (!%p290_p10, %s1077_s15), 31 }
  0x16   : > { %s1078_s29 = sshll.u32 %s1718_s15, 3 }
  0x17   : > { %s1516_s13 = scalar_lea.vmem %s1704_s1, %s1078_s29  ;;  %s1541_s18 = scalar_lea.vmem %s1703_s0, %s1078_s29 }
  0x18   : > { %v321_v7 = vld [vmem:[%s1516_s13] sm:$0xff]  ;;  %v322_v8 = vld [vmem:[%s1516_s13 + $0x8] sm:$0xff]  ;;  %v323_v9 = vld [vmem:[%s1516_s13 + $0x10] sm:$0xff] }
  0x19   : > { %1193 = vmatprep.mubr.msk.f32.mxu0 %vm338_vm0, %v321_v7  ;;  %v324_v11 = vld [vmem:[%s1516_s13 + $0x18] sm:$0xff]  ;;  %v325_v12 = vld [vmem:[%s1516_s13 + $0x20] sm:$0xff]  ;;  %v330_v14 = vld [vmem:[%s1516_s13 + $0x48] sm:$0xff] }
  0x1a   : > { %1194 = vmatmul.mubr.msk.f32.vlgmr.msra.gmra.mrb[0].mxu0 %vm338_vm0, %v322_v8  ;;  %v329_v13 = vld [vmem:[%s1516_s13 + $0x40] sm:$0xff]  ;;  %v331_v15 = vld [vmem:[%s1516_s13 + $0x50] sm:$0xff]  ;;  %v326_v16 = vld [vmem:[%s1516_s13 + $0x28] sm:$0xff] }
  0x1b   : > { %1278 = vmatpush3.bf16.msra.mxu0 %v1275_v3  ;;  %1196 = vmatprep.mubr.msk.f32.mxu0 %vm338_vm0, %v323_v9  ;;  %v327_v17 = vld [vmem:[%s1516_s13 + $0x30] sm:$0xff]  ;;  %v332_v18 = vld [vmem:[%s1516_s13 + $0x58] sm:$0xff]  ;;  %v333_v19 = vld [vmem:[%s1516_s13 + $0x60] sm:$0xff] }
  0x1c   : > { %1221 = vmatprep.subr.mxu0 %v320_v10  ;;  %1205 = vmatprep.mubr.msk.f32.mxu1 %vm338_vm0, %v329_v13  ;;  %v328_v20 = vld [vmem:[%s1516_s13 + $0x38] sm:$0xff]  ;;  %v302_v21 = vld [vmem:[%s1541_s18] sm:$0xff]  ;;  %v334_v22 = vld [vmem:[%s1516_s13 + $0x68] sm:$0xff] }
  0x1d   : > { %1206 = vmatmul.mubr.msk.f32.vlgmr.msra.gmra.mrb[0].mxu1 %vm338_vm0, %v330_v14  ;;  %v335_v23 = vld [vmem:[%s1516_s13 + $0x70] sm:$0xff]  ;;  %v303_v24 = vld [vmem:[%s1541_s18 + $0x8] sm:$0xff]  ;;  %v336_v26 = vld [vmem:[%s1516_s13 + $0x78] sm:$0xff]  ;;  %s998_s13 = sshll.u32 %s1633_s8, 4  ;;  %s1656_s13 = int_to_ptr.vmem [resolvable:$true] %s998_s13 }
  0x1e   : > { %1197 = vmatmul.mubr.msk.f32.gmra.mrb[2].mxu0 %vm338_vm0, %v324_v11  ;;  %1208 = vmatprep.mubr.msk.f32.mxu1 %vm338_vm0, %v331_v15  ;;  %v304_v25 = vld [vmem:[%s1541_s18 + $0x10] sm:$0xff]  ;;  %v305_v27 = vld [vmem:[%s1541_s18 + $0x18] sm:$0xff]  ;;  %v306_v28 = vld [vmem:[%s1541_s18 + $0x20] sm:$0xff]  ;;  %s1342_s17 = scalar_lea.vmem %s1656_s13, 2048 }
  0x1f   : > { %1199 = vmatprep.mubr.msk.f32.mxu0 %vm338_vm0, %v325_v12  ;;  %1222 = vmatpush3.msra.mxu0 %v320_v10  ;;  %v307_v29 = vld [vmem:[%s1541_s18 + $0x28] sm:$0xff]  ;;  %v308_v30 = vld [vmem:[%s1541_s18 + $0x30] sm:$0xff]  ;;  %v309_v31 = vld [vmem:[%s1541_s18 + $0x38] sm:$0xff]  ;;  %p1343_p11 = scmp.ne.s32.totalorder %s1656_s13, %s1342_s17 }
  0x20   : > { %1282 = vmatpush3.bf16.msra.mxu1 %v1279_v6  ;;  %v310_v32 = vld [vmem:[%s1541_s18 + $0x40] sm:$0xff]  ;;  %v311_v33 = vld [vmem:[%s1541_s18 + $0x48] sm:$0xff]  ;;  %v312_v34 = vld [vmem:[%s1541_s18 + $0x50] sm:$0xff] }
  0x21   : > { %1209 = vmatmul.mubr.msk.f32.gmra.mrb[2].mxu1 %vm338_vm0, %v332_v18  ;;  %v313_v35 = vld [vmem:[%s1541_s18 + $0x58] sm:$0xff]  ;;  %v314_v36 = vld [vmem:[%s1541_s18 + $0x60] sm:$0xff]  ;;  %v315_v37 = vld [vmem:[%s1541_s18 + $0x68] sm:$0xff]  ;;  %p1344_p12 = pnand %p1343_p11, %p1487_p5 }
  0x22   : > { %1200 = vmatmul.mubr.msk.f32.gmra.mrb[4].mxu0 %vm338_vm0, %v326_v16  ;;  %1211 = vmatprep.mubr.msk.f32.mxu1 %vm338_vm0, %v333_v19  ;;  %v316_v38 = vld [vmem:[%s1541_s18 + $0x70] sm:$0xff]  ;;  %v317_v39 = vld [vmem:[%s1541_s18 + $0x78] sm:$0xff]  ;;  %s1406_s18 = smov [#allocation2]  }
  0x23   : > { %1202 = vmatprep.mubr.msk.f32.mxu0 %vm338_vm0, %v327_v17  ;;  %p1345_p13 = pneg %p1344_p12  ;;  %s1346_s19 = sshll.u32 %s1406_s18, 4  ;;  %s1347_s19 = int_to_ptr.vmem [resolvable:$false] %s1346_s19 }
  0x24   : > { %s1348_s20 = scalar_lea.vmem %s1347_s19, 4096  ;;  %p1349_p0 = scmp.lt.s32.totalorder %s1656_s13, %s1347_s19 }
  0x25   : > { %1212 = vmatmul.mubr.msk.f32.gmra.mrb[4].mxu1 %vm338_vm0, %v334_v22  ;;  %p1350_p1 = scmp.lt.s32.totalorder %s1348_s20, %s1342_s17 }
  0x26   : > { %1203 = vmatmul.mubr.msk.f32.gmra.mrb[6].mxu0 %vm338_vm0, %v328_v20  ;;  %1214 = vmatprep.mubr.msk.f32.mxu1 %vm338_vm0, %v335_v23 }
  0x27   : > { %1223 = vmatprep.mubr.msk.f32.mxu0 %vm532_vm1, %v302_v21  ;;  %p1351_p2 = por %p1350_p1, %p1349_p0 }
  0x29   : > { %1215 = vmatmul.mubr.msk.f32.gmra.mrb[6].mxu1 %vm338_vm0, %v336_v26  ;;  %p1352_p3 = pnand %p1351_p2, %p1345_p13 }
  0x2a   : > { %1224 = vmatmul.mubr.msk.f32.vlgmr.msra.gmra.mrb[0].mxu0 %vm532_vm1, %v303_v24 }
  0x2b   : > { %1226 = vmatprep.mubr.msk.f32.mxu0 %vm532_vm1, %v304_v25 }
  0x2e   : > { %1227 = vmatmul.mubr.msk.f32.gmra.mrb[2].mxu0 %vm532_vm1, %v305_v27 }
  0x2f   : > { %1229 = vmatprep.mubr.msk.f32.mxu0 %vm532_vm1, %v306_v28 }
  0x32   : > { %1230 = vmatmul.mubr.msk.f32.gmra.mrb[4].mxu0 %vm532_vm1, %v307_v29 }
  0x33   : > { %1232 = vmatprep.mubr.msk.f32.mxu0 %vm532_vm1, %v308_v30 }
  0x36   : > { %1233 = vmatmul.mubr.msk.f32.gmra.mrb[6].mxu0 %vm532_vm1, %v309_v31 }
  0x37   : > { %1235 = vmatprep.mubr.msk.f32.mxu0 %vm532_vm1, %v310_v32 }
  0x3a   : > { %1236 = vmatmul.mubr.msk.f32.gmra.mrb[8].mxu0 %vm532_vm1, %v311_v33 }
  0x3b   : > { %1238 = vmatprep.mubr.msk.f32.mxu0 %vm532_vm1, %v312_v34 }
  0x3e   : > { %1239 = vmatmul.mubr.msk.f32.gmra.mrb[10].mxu0 %vm532_vm1, %v313_v35 }
  0x3f   : > { %1241 = vmatprep.mubr.msk.f32.mxu0 %vm532_vm1, %v314_v36 }
  0x42   : > { %1242 = vmatmul.mubr.msk.f32.gmra.mrb[12].mxu0 %vm532_vm1, %v315_v37 }
  0x43   : > { %1244 = vmatprep.mubr.msk.f32.mxu0 %vm532_vm1, %v316_v38 }
  0x46   : > { %1245 = vmatmul.mubr.msk.f32.gmra.mrb[14].mxu0 %vm532_vm1, %v317_v39 }
  0xf0   : > { %v1207_v40 = vpop.f32.mrb[0].mxu1 }
  0xf1   : > { %v493_v41 = vpop.f32.mrb[1].mxu1 }
  0xf4   : > { %v1210_v42 = vpop.f32.mrb[2].mxu1 }
  0xf5   : > { %v503_v43 = vpop.f32.mrb[3].mxu1 }
  0xf8   : > { %v1213_v45 = vpop.f32.mrb[4].mxu1 }
  0xf9   : > { %v513_v46 = vpop.f32.mrb[5].mxu1 }
  0xfc   : > { %v1216_v51 = vpop.f32.mrb[6].mxu1 }
  0xfd   : > { %v1225_v47 = vpop.f32.mrb[0].mxu0  ;;  %v523_v52 = vpop.f32.mrb[7].mxu1 }
  0xfe   : > { %v734_v48 = vadd.f32 %v1225_v47, %v1593_v44  ;;  %v647_v49 = vpop.f32.mrb[1].mxu0 }
  0xff   : > { %v733_v50 = vadd.f32 %v1593_v44, %v647_v49 }
 0x100   : > { %v750_v55 = vmax.f32 %v734_v48, 0.0 }
 0x101   : > { %v749_v53 = vmax.f32 %v733_v50, 0.0  ;;  %v1228_v54 = vpop.f32.mrb[2].mxu0 }
 0x102   : > { %v736_v56 = vadd.f32 %v1228_v54, %v1593_v44  ;;  %v657_v57 = vpop.f32.mrb[3].mxu0 }
 0x103   : > { %v735_v58 = vadd.f32 %v1593_v44, %v657_v57  ;;  %1251 = vmatprep.mubr.msk.f32.mxu1 %vm774_vm2, %v749_v53 }
 0x104   : > { %1252 = vmatmul.mubr.msk.f32.vlgmr.msra.gmra.mrb[8].mxu1 %vm774_vm2, %v750_v55  ;;  %v752_v61 = vmax.f32 %v736_v56, 0.0 }
 0x105   : > { %v751_v59 = vmax.f32 %v735_v58, 0.0  ;;  %v1231_v60 = vpop.f32.mrb[4].mxu0 }
 0x106   : > { %v738_v62 = vadd.f32 %v1231_v60, %v1593_v44  ;;  %v667_v63 = vpop.f32.mrb[5].mxu0 }
 0x107   : > { %v737_v0 = vadd.f32 %v1593_v44, %v667_v63  ;;  %1254 = vmatprep.mubr.msk.f32.mxu1 %vm774_vm2, %v751_v59 }
 0x108   : > { %1255 = vmatmul.mubr.msk.f32.gmra.mrb[10].mxu1 %vm774_vm2, %v752_v61  ;;  %v754_v3 = vmax.f32 %v738_v62, 0.0 }
 0x109   : > { %v753_v1 = vmax.f32 %v737_v0, 0.0  ;;  %v1234_v2 = vpop.f32.mrb[6].mxu0 }
 0x10a   : > { %v740_v4 = vadd.f32 %v1234_v2, %v1593_v44  ;;  %v677_v5 = vpop.f32.mrb[7].mxu0 }
 0x10b   : > { %v739_v6 = vadd.f32 %v1593_v44, %v677_v5  ;;  %1257 = vmatprep.mubr.msk.f32.mxu1 %vm774_vm2, %v753_v1 }
 0x10c   : > { %1258 = vmatmul.mubr.msk.f32.gmra.mrb[12].mxu1 %vm774_vm2, %v754_v3  ;;  %v756_v9 = vmax.f32 %v740_v4, 0.0 }
 0x10d   : > { %v755_v7 = vmax.f32 %v739_v6, 0.0  ;;  %v1237_v8 = vpop.f32.mrb[8].mxu0 }
 0x10e   : > { %v693_v10 = vadd.f32 %v1237_v8, %v1207_v40  ;;  %v687_v11 = vpop.f32.mrb[9].mxu0 }
 0x10f   : > { %v688_v12 = vadd.f32 %v687_v11, %v493_v41  ;;  %1260 = vmatprep.mubr.msk.f32.mxu1 %vm774_vm2, %v755_v7  ;;  %v1114_v41 = vld [vmem:[%s1709_s6] ss:$0 sm:$0xff] }
 0x110   : > { %v742_v13 = vadd.f32 %v1593_v44, %v693_v10  ;;  %1261 = vmatmul.mubr.msk.f32.gmra.mrb[14].mxu1 %vm774_vm2, %v756_v9 }
 0x111   : > { %v741_v14 = vadd.f32 %v1593_v44, %v688_v12  ;;  %v1240_v15 = vpop.f32.mrb[10].mxu0 }
 0x112   : > { %v703_v16 = vadd.f32 %v1240_v15, %v1210_v42  ;;  %v697_v17 = vpop.f32.mrb[11].mxu0  ;;  %v758_v20 = vmax.f32 %v742_v13, 0.0 }
 0x113   : > { %v757_v18 = vmax.f32 %v741_v14, 0.0  ;;  %v698_v19 = vadd.f32 %v697_v17, %v503_v43 }
 0x114   : > { %v744_v21 = vadd.f32 %v1593_v44, %v703_v16 }
 0x115   : > { %v743_v22 = vadd.f32 %v1593_v44, %v698_v19  ;;  %v1243_v23 = vpop.f32.mrb[12].mxu0  ;;  %1263 = vmatprep.mubr.msk.f32.mxu1 %vm774_vm2, %v757_v18 }
 0x116   : > { %v713_v24 = vadd.f32 %v1243_v23, %v1213_v45  ;;  %v707_v25 = vpop.f32.mrb[13].mxu0  ;;  %1264 = vmatmul.mubr.msk.f32.gmra.mrb[16].mxu1 %vm774_vm2, %v758_v20  ;;  %v760_v28 = vmax.f32 %v744_v21, 0.0 }
 0x117   : > { %v759_v26 = vmax.f32 %v743_v22, 0.0  ;;  %v708_v27 = vadd.f32 %v707_v25, %v513_v46 }
 0x118   : > { %v746_v29 = vadd.f32 %v1593_v44, %v713_v24 }
 0x119   : > { %v745_v30 = vadd.f32 %v1593_v44, %v708_v27  ;;  %v1246_v31 = vpop.f32.mrb[14].mxu0  ;;  %1266 = vmatprep.mubr.msk.f32.mxu1 %vm774_vm2, %v759_v26 }
 0x11a   : > { %v723_v32 = vadd.f32 %v1246_v31, %v1216_v51  ;;  %v717_v33 = vpop.f32.mrb[15].mxu0  ;;  %1267 = vmatmul.mubr.msk.f32.gmra.mrb[18].mxu1 %vm774_vm2, %v760_v28  ;;  %v762_v36 = vmax.f32 %v746_v29, 0.0 }
 0x11b   : > { %v761_v34 = vmax.f32 %v745_v30, 0.0  ;;  %v718_v35 = vadd.f32 %v717_v33, %v523_v52 }
 0x11c   : > { %v748_v37 = vadd.f32 %v1593_v44, %v723_v32 }
 0x11d   : > { %v747_v38 = vadd.f32 %v1593_v44, %v718_v35  ;;  %1269 = vmatprep.mubr.msk.f32.mxu1 %vm774_vm2, %v761_v34 }
 0x11e   : > { %1270 = vmatmul.mubr.msk.f32.gmra.mrb[20].mxu1 %vm774_vm2, %v762_v36  ;;  %v764_v40 = vmax.f32 %v748_v37, 0.0 }
 0x11f   : > { %v763_v39 = vmax.f32 %v747_v38, 0.0 }
 0x121   : > { %1272 = vmatprep.mubr.msk.f32.mxu1 %vm774_vm2, %v763_v39 }
 0x122   : > { %1273 = vmatmul.mubr.msk.f32.gmra.mrb[22].mxu1 %vm774_vm2, %v764_v40 }
 0x1d7   : > { %v1253_v42 = vpop.f32.mrb[8].mxu1 }
 0x1d8   : > { %v895_v43 = vadd.f32 %v1253_v42, %v1114_v41  ;;  %v889_v44 = vpop.f32.mrb[9].mxu1 }
 0x1d9   : > { %v890_v45 = vadd.f32 %v1114_v41, %v889_v44 }
 0x1da   : > { %969 = vst [vmem:[%s1633_s8 + $0x8] sm:$0xff] %v895_v43 }
 0x1db   : > { %968 = vst [vmem:[%s1633_s8] sm:$0xff] %v890_v45  ;;  %v1256_v46 = vpop.f32.mrb[10].mxu1 }
 0x1dc   : > { %v905_v47 = vadd.f32 %v1256_v46, %v1114_v41  ;;  %v899_v48 = vpop.f32.mrb[11].mxu1 }
 0x1dd   : > { %v900_v49 = vadd.f32 %v1114_v41, %v899_v48 }
 0x1de   : > { %971 = vst [vmem:[%s1633_s8 + $0x18] sm:$0xff] %v905_v47 }
 0x1df   : > { %970 = vst [vmem:[%s1633_s8 + $0x10] sm:$0xff] %v900_v49  ;;  %v1259_v50 = vpop.f32.mrb[12].mxu1 }
 0x1e0   : > { %v915_v51 = vadd.f32 %v1259_v50, %v1114_v41  ;;  %v909_v52 = vpop.f32.mrb[13].mxu1 }
 0x1e1   : > { %v910_v53 = vadd.f32 %v1114_v41, %v909_v52 }
 0x1e2   : > { %973 = vst [vmem:[%s1633_s8 + $0x28] sm:$0xff] %v915_v51 }
 0x1e3   : > { %972 = vst [vmem:[%s1633_s8 + $0x20] sm:$0xff] %v910_v53  ;;  %v1262_v54 = vpop.f32.mrb[14].mxu1 }
 0x1e4   : > { %v925_v55 = vadd.f32 %v1262_v54, %v1114_v41  ;;  %v919_v56 = vpop.f32.mrb[15].mxu1 }
 0x1e5   : > { %v920_v57 = vadd.f32 %v1114_v41, %v919_v56 }
 0x1e6   : > { %975 = vst [vmem:[%s1633_s8 + $0x38] sm:$0xff] %v925_v55 }
 0x1e7   : > { %974 = vst [vmem:[%s1633_s8 + $0x30] sm:$0xff] %v920_v57 }
 0x1e9   : > { %v1265_v58 = vpop.f32.mrb[16].mxu1 }
 0x1ea   : > { %v935_v59 = vadd.f32 %v1265_v58, %v1114_v41  ;;  %v929_v60 = vpop.f32.mrb[17].mxu1 }
 0x1eb   : > { %v930_v61 = vadd.f32 %v1114_v41, %v929_v60 }
 0x1ec   : > { %977 = vst [vmem:[%s1633_s8 + $0x48] sm:$0xff] %v935_v59 }
 0x1ed   : > { %976 = vst [vmem:[%s1633_s8 + $0x40] sm:$0xff] %v930_v61  ;;  %v1268_v62 = vpop.f32.mrb[18].mxu1 }
 0x1ee   : > { %v945_v63 = vadd.f32 %v1268_v62, %v1114_v41  ;;  %v939_v0 = vpop.f32.mrb[19].mxu1 }
 0x1ef   : > { %v940_v1 = vadd.f32 %v1114_v41, %v939_v0 }
 0x1f0   : > { %979 = vst [vmem:[%s1633_s8 + $0x58] sm:$0xff] %v945_v63 }
 0x1f1   : > { %978 = vst [vmem:[%s1633_s8 + $0x50] sm:$0xff] %v940_v1  ;;  %v1271_v2 = vpop.f32.mrb[20].mxu1 }
 0x1f2   : > { %v955_v3 = vadd.f32 %v1271_v2, %v1114_v41  ;;  %v949_v4 = vpop.f32.mrb[21].mxu1 }
 0x1f3   : > { %v950_v5 = vadd.f32 %v1114_v41, %v949_v4 }
 0x1f4   : > { %981 = vst [vmem:[%s1633_s8 + $0x68] sm:$0xff] %v955_v3 }
 0x1f5   : > { %980 = vst [vmem:[%s1633_s8 + $0x60] sm:$0xff] %v950_v5  ;;  %v1274_v6 = vpop.f32.mrb[22].mxu1 }
 0x1f6   : > { %v965_v7 = vadd.f32 %v1274_v6, %v1114_v41  ;;  %v959_v8 = vpop.f32.mrb[23].mxu1 }
 0x1f7   : > { %v960_v9 = vadd.f32 %v1114_v41, %v959_v8 }
 0x1f8   : > { %983 = vst [vmem:[%s1633_s8 + $0x78] sm:$0xff] %v965_v7 }
 0x1f9   : > { %982 = vst [vmem:[%s1633_s8 + $0x70] sm:$0xff] %v960_v9 }
 0x1fa   : > { %1355 = shalt.err (!%p1352_p3)
}
 0x1fb   : > { %s1356_s21 = scalar_lea.hbm %s1654_s16, 2048  ;;  %s1360_s29 = scalar_lea.hbm %s1710_s7, 4096 }
 0x1fc   : > { %p1357_p4 = scmp.ne.s32.totalorder %s1654_s16, %s1356_s21  ;;  %p1361_p9 = scmp.lt.u32.totalorder %s1654_s16, %s1710_s7 }
 0x1fd   : > { %p1362_p10 = scmp.lt.u32.totalorder %s1360_s29, %s1356_s21  ;;  %p1364_p12 = scmp.lt.u32.totalorder %s1356_s21, %s1654_s16 }
 0x1fe   : > { %p1358_p7 = pnand %p1357_p4, %p1487_p5 }
 0x1ff   : > { %p1363_p11 = por %p1362_p10, %p1361_p9 }
 0x200   : > { %p1359_p8 = pneg %p1358_p7 }
 0x201   : > { %p1365_p13 = por %p1364_p12, %p1363_p11 }
 0x203   : > { %p1366_p0 = pnand %p1365_p13, %p1359_p8 }
 0x205   : > { %1369 = shalt.err (!%p1366_p0)
}
 0x206   : > { %s1407_s14 = smov 128   ;;  %s1408_s15 = smov 8  }
 0x207   : > { %1301 = dma.vmem_to_hbm [thread:$0]  (%p1487_p5), %s1656_s13, 2048, %s1654_s16, %s1662_s28, %s1407_s14, %s1407_s14, %s1408_s15  }
 0x208 PF: > { %p1307_p1 = scmp.ge.s32.totalorder %s1404_s27, 2  ;;  %s1013_s17 = sand.u32 1, %s1392_s24  }
 0x209   : > { %s1014_s18 = scalar_lea.sflag [#allocation3], %s1013_s17 }
 0x20a   : > { %p1304_p2 = pnand %p1307_p1, %p1491_p6 }
 0x20c   : > { %1387 = dma.done.wait (!%p1304_p2), %s1014_s18, 2048  }
 0x20d   : > { %1389 = vsyncadd (!%p1304_p2), %s1014_s18, 4294965248  ;;  %p17_p3 = scmp.ge.s32.totalorder %s1474_s30, 4   ;;  %s1713_s24 = smov %s1396_s25 }
 0x20e   : > { %s1714_s25 = smov %s1400_s26  ;;  %s1715_s26 = smov %s1485_s10 }
 0x20f   : > { %s1716_s27 = smov %s1474_s30  ;;  %19 = sbr.rel (!%p17_p3) target bundleno = 3 (0x3), region = 86 }
 0x216   :  { %1019 = vsyncpa [#allocation3], 1 }
 0x217   :  { %1021 = vsyncpa [#allocation3 + $0x1], 1 }

</bundles_post_ra>
